<compile_context>
chip_gen: v7x
topology: tpu7x:2x2x1
jax: 0.10.0
libtpu: 0.0.40
codegen_flags: <defaults>
</compile_context>

<pallas_src>
import functools

import numpy as np
import jax
import jax.numpy as jnp
from jax.experimental import pallas as pl
from jax.experimental.pallas import tpu as pltpu


# ----------------------------- Pallas kernel --------------------------------
def _rep_bottleneck_kernel(x_ref, t1_ref, b1_ref, t2_ref, b2_ref, o_ref, *, H, add):
    # x_ref:  (M, W*C1)            f32  lane-dense input rows (M = batch_tile*H)
    # t1_ref: (3, W*C1,  W*Chp)    bf16 RepConv block-Toeplitz weights (kh = 0,1,2)
    # b1_ref: (1, W*Chp)           f32  RepConv bias tiled across W
    # t2_ref: (3, W*Chp, W*C2)     bf16 cv2 block-Toeplitz weights
    # b2_ref: (1, W*C2)            f32  cv2 bias tiled across W
    # o_ref:  (M, W*C2)            f32  lane-dense output rows
    x = x_ref[...]                                        # (M, W*C1) f32
    M = x.shape[0]

    row = jax.lax.broadcasted_iota(jnp.int32, (M, 1), 0)
    not_top = (row % H) != 0            # a row above exists inside the same image
    not_bot = (row % H) != (H - 1)      # a row below exists inside the same image

    def conv3x3_silu(v_bf16, t_ref, b_ref):
        # Row r of the output:  x[r-1] @ T[0] + x[r] @ T[1] + x[r+1] @ T[2]
        p_up  = jnp.dot(v_bf16, t_ref[0], preferred_element_type=jnp.float32)
        p_mid = jnp.dot(v_bf16, t_ref[1], preferred_element_type=jnp.float32)
        p_dn  = jnp.dot(v_bf16, t_ref[2], preferred_element_type=jnp.float32)
        acc = p_mid + b_ref[...]
        # sublane rotations (XLU) + boundary masks replace zero-padding in H
        acc = acc + jnp.where(not_top, pltpu.roll(p_up, shift=1, axis=0), 0.0)
        acc = acc + jnp.where(not_bot, pltpu.roll(p_dn, shift=M - 1, axis=0), 0.0)
        return acc * jax.nn.sigmoid(acc)                  # SiLU in f32 (EUP)

    y1 = conv3x3_silu(x.astype(jnp.bfloat16), t1_ref, b1_ref)    # (M, W*Chp)
    y2 = conv3x3_silu(y1.astype(jnp.bfloat16), t2_ref, b2_ref)   # (M, W*C2)
    out = y2 + x if add else y2                                   # shortcut (C1 == C2)
    o_ref[...] = out.astype(o_ref.dtype)


# ------------------------------- wrapper -------------------------------------
@functools.partial(jax.jit, static_argnames=("add", "batch_tile"))
def rep_bottleneck_pallas(x_nchw, packed, add=True, batch_tile=None):
    """x_nchw: (N, C1, H, W) float32. `packed` holds lane-dense Toeplitz weights."""
    N, C1, H, W = x_nchw.shape
    t1, b1, t2, b2 = packed["t1"], packed["b1"], packed["t2"], packed["b2"]
    WC2 = t2.shape[-1]
    C2 = WC2 // W
    if add and C1 != C2:
        raise ValueError("shortcut add requires c1 == c2")
    # NOTE: W*C1 and W*C2 should be multiples of 128 for unmasked lane-dense
    # stores (true for the test config); other shapes stay correct but slower.

    # NCHW -> lane-dense (N*H, W*C1), fused inside this jit.
    x_ld = jnp.transpose(x_nchw, (0, 2, 3, 1)).reshape(N * H, W * C1)

    if batch_tile is None:
        # >=2 grid steps when N >= 2 (keeps both v7x TensorCores busy) while
        # folding the remaining batch into each block (amortizes the ~0.35 us
        # per-step overhead on single-TC v5e/v6e).
        batch_tile = max(1, N // 2)
    nb = batch_tile
    assert N % nb == 0, "batch_tile must divide N"
    Mb = nb * H

    kernel = functools.partial(_rep_bottleneck_kernel, H=H, add=add)
    out_ld = pl.pallas_call(
        kernel,
        out_shape=jax.ShapeDtypeStruct((N * H, WC2), jnp.float32),
        grid_spec=pltpu.PrefetchScalarGridSpec(
            num_scalar_prefetch=0,
            grid=(N // nb,),
            in_specs=[
                pl.BlockSpec((Mb, W * C1), lambda n: (n, 0)),
                pl.BlockSpec(t1.shape, lambda n: (0, 0, 0)),   # resident weights
                pl.BlockSpec(b1.shape, lambda n: (0, 0)),
                pl.BlockSpec(t2.shape, lambda n: (0, 0, 0)),
                pl.BlockSpec(b2.shape, lambda n: (0, 0)),
            ],
            out_specs=pl.BlockSpec((Mb, WC2), lambda n: (n, 0)),
        ),
        compiler_params=pltpu.CompilerParams(
            dimension_semantics=("parallel",),
            vmem_limit_bytes=16 * 1024 * 1024),
    )(x_ld, t1, b1, t2, b2)

    out = out_ld.reshape(N, H, W, C2)
    return jnp.transpose(out, (0, 3, 1, 2))               # back to NCHW


# ------------------------- parameter construction ---------------------------
def _bn_params(key, c):
    k0, k1, k2, k3 = jax.random.split(key, 4)
    gamma = 1.0 + 0.1 * jax.random.normal(k0, (c,), jnp.float32)
    beta = 0.1 * jax.random.normal(k1, (c,), jnp.float32)
    mean = 0.1 * jax.random.normal(k2, (c,), jnp.float32)
    var = 1.0 + 0.1 * jax.random.uniform(k3, (c,), jnp.float32)
    return gamma, beta, mean, var


def _fold(w_hwio, bn, eps=1e-5):
    gamma, beta, mean, var = bn
    scale = gamma / jnp.sqrt(var + eps)
    return w_hwio * scale, beta - mean * scale


def make_params(c1, c2, e=0.5, seed=0):
    """Raw params (for the reference) + BN-folded, reparameterized HWIO weights."""
    c_ = int(c2 * e)
    ks = jax.random.split(jax.random.PRNGKey(seed), 6)
    w_rep3 = 0.1 * jax.random.normal(ks[0], (3, 3, c1, c_), jnp.float32)
    w_rep1 = 0.1 * jax.random.normal(ks[1], (1, 1, c1, c_), jnp.float32)
    w_cv2 = 0.1 * jax.random.normal(ks[2], (3, 3, c_, c2), jnp.float32)
    bn_rep3 = _bn_params(ks[3], c_)
    bn_rep1 = _bn_params(ks[4], c_)
    bn_cv2 = _bn_params(ks[5], c2)
    raw = dict(w_rep3=w_rep3, w_rep1=w_rep1, w_cv2=w_cv2,
               bn_rep3=bn_rep3, bn_rep1=bn_rep1, bn_cv2=bn_cv2)

    # fold BN (eval-mode running stats) into weights + biases
    w3a, b3a = _fold(w_rep3, bn_rep3)
    w1b, b1b = _fold(w_rep1, bn_rep1)
    w3c, b3c = _fold(w_cv2, bn_cv2)
    # RepConv reparameterization: merge the 1x1 branch into the 3x3 center tap
    w_rep = w3a.at[1, 1].add(w1b[0, 0])
    folded = dict(w1=w_rep, b1=b3a + b1b, w2=w3c, b2=b3c)
    return raw, folded


def _pad_cout(c, w):
    """Smallest c' >= c with (w * c') % 128 == 0 (bounded search)."""
    for cp in range(c, c + 129):
        if (w * cp) % 128 == 0:
            return cp
    return c


def _toeplitz(w_hwio, W, cin_pad, cout_pad):
    """(3,3,Cin,Cout) conv weights -> 3 lane-dense block-Toeplitz matrices."""
    _, _, cin, cout = w_hwio.shape
    t = np.zeros((3, W * cin_pad, W * cout_pad), np.float32)
    w = np.asarray(w_hwio, np.float32)
    for kh in range(3):                      # kh = 0,1,2  <->  dh = -1,0,+1
        for wo in range(W):
            for dw in (-1, 0, 1):
                wi = wo + dw
                if 0 <= wi < W:
                    t[kh,
                      wi * cin_pad: wi * cin_pad + cin,
                      wo * cout_pad: wo * cout_pad + cout] = w[kh, dw + 1]
    return t


def _tile_bias(b, W, cout_pad):
    cout = b.shape[0]
    bl = np.zeros((W, cout_pad), np.float32)
    bl[:, :cout] = np.asarray(b, np.float32)[None, :]
    return bl.reshape(1, W * cout_pad)


def pack_for_kernel(folded, W):
    """BN-folded HWIO weights -> lane-dense block-Toeplitz kernel operands."""
    c1, ch = folded["w1"].shape[2], folded["w1"].shape[3]
    c2 = folded["w2"].shape[3]
    chp = _pad_cout(ch, W)                  # pad hidden channels: W*chp % 128 == 0
    t1 = _toeplitz(folded["w1"], W, c1, chp)
    t2 = _toeplitz(folded["w2"], W, chp, c2)  # zero rows for padded hidden channels
    return dict(
        t1=jnp.asarray(t1, jnp.bfloat16),
        b1=jnp.asarray(_tile_bias(folded["b1"], W, chp), jnp.float32),
        t2=jnp.asarray(t2, jnp.bfloat16),
        b2=jnp.asarray(_tile_bias(folded["b2"], W, c2), jnp.float32),
    )


# --------------------------- pure-JAX reference ------------------------------
def rep_bottleneck_ref(x_nchw, raw, *, add=True, eps=1e-5):
    x = jnp.transpose(x_nchw, (0, 2, 3, 1))

    def conv(v, w, pad):
        return jax.lax.conv_general_dilated(
            v, w, (1, 1), [(pad, pad), (pad, pad)],
            dimension_numbers=("NHWC", "HWIO", "NHWC"))

    def bn(v, p):
        g, b, m, s = p
        return (v - m) / jnp.sqrt(s + eps) * g + b

    y1 = jax.nn.silu(bn(conv(x, raw["w_rep3"], 1), raw["bn_rep3"])
                     + bn(conv(x, raw["w_rep1"], 0), raw["bn_rep1"]))
    y2 = jax.nn.silu(bn(conv(y1, raw["w_cv2"], 1), raw["bn_cv2"]))
    out = x + y2 if add else y2
    return jnp.transpose(out, (0, 3, 1, 2))


# --------------------------------- main --------------------------------------
if __name__ == "__main__":
    N, C1, C2, H, W = 2, 8, 8, 16, 16          # shortcut active: c1 == c2; W*C = 128
    raw, folded = make_params(C1, C2, e=0.5, seed=0)
    packed = pack_for_kernel(folded, W)
    x = jax.random.normal(jax.random.PRNGKey(0), (N, C1, H, W), jnp.float32)

    out = rep_bottleneck_pallas(x, packed, add=True)
    out = jax.block_until_ready(out)

    ref = rep_bottleneck_ref(x, raw, add=True)
    assert out.shape == (N, C2, H, W)
    err = float(jnp.max(jnp.abs(out - ref)))
    # bf16 matmul operands -> looser tolerance than pure-f32.
    assert err < 5e-2, err
    print("KERNEL_OK")
</pallas_src>

<mosaic_0001>
module attributes {stable_mosaic.version = 11 : i64} {
  func.func @_rep_bottleneck_kernel(%arg0: i32, %arg1: memref<16x128xf32, #tpu.memory_space<vmem>>, %arg2: memref<3x128x128xbf16, #tpu.memory_space<vmem>>, %arg3: memref<1x128xf32, #tpu.memory_space<vmem>>, %arg4: memref<3x128x128xbf16, #tpu.memory_space<vmem>>, %arg5: memref<1x128xf32, #tpu.memory_space<vmem>>, %arg6: memref<16x128xf32, #tpu.memory_space<vmem>>) attributes {dimension_semantics = [#tpu.dimension_semantics<parallel>], iteration_bounds = array<i64: 2>, scalar_prefetch = 0 : i64, scratch_operands = 0 : i64, tpu.core_type = #tpu.core_type<tc>, window_params = [{transform_indices = @transform_0, window_bounds = array<i64: 16, 128>}, {pipeline_mode = #tpu.pipeline_mode<synchronous>, transform_indices = @transform_1, window_bounds = array<i64: 3, 128, 128>}, {pipeline_mode = #tpu.pipeline_mode<synchronous>, transform_indices = @transform_2, window_bounds = array<i64: 1, 128>}, {pipeline_mode = #tpu.pipeline_mode<synchronous>, transform_indices = @transform_3, window_bounds = array<i64: 3, 128, 128>}, {pipeline_mode = #tpu.pipeline_mode<synchronous>, transform_indices = @transform_4, window_bounds = array<i64: 1, 128>}, {transform_indices = @transform_5, window_bounds = array<i64: 16, 128>}]} {
    %c0 = arith.constant 0 : index
    %c0_0 = arith.constant 0 : index
    %0 = vector.load %arg1[%c0, %c0_0] : memref<16x128xf32, #tpu.memory_space<vmem>>, vector<16x128xf32>
    %1 = tpu.iota {dimensions = array<i32: 0>} : vector<16x1xi32>
    %c16_i32 = arith.constant 16 : i32
    %c0_i32 = arith.constant 0 : i32
    %2 = arith.cmpi eq, %c16_i32, %c0_i32 : i32
    %c1_i32 = arith.constant 1 : i32
    %3 = arith.select %2, %c1_i32, %c16_i32 : i32
    %4 = vector.broadcast %3 : i32 to vector<16x1xi32>
    %5 = arith.remsi %1, %4 : vector<16x1xi32>
    %c0_i32_1 = arith.constant 0 : i32
    %6 = vector.broadcast %c0_i32_1 : i32 to vector<16x1xi32>
    %7 = arith.cmpi ne, %5, %6 : vector<16x1xi32>
    %c0_i32_2 = arith.constant 0 : i32
    %8 = vector.broadcast %c0_i32_2 : i32 to vector<16x1xi32>
    %9 = arith.cmpi slt, %5, %8 : vector<16x1xi32>
    %c0_i32_3 = arith.constant 0 : i32
    %10 = arith.cmpi slt, %3, %c0_i32_3 : i32
    %11 = vector.broadcast %10 : i1 to vector<16x1xi1>
    %12 = vector.broadcast %11 : vector<16x1xi1> to vector<16x1xi1>
    %13 = arith.xori %9, %12 : vector<16x1xi1>
    %14 = arith.andi %13, %7 : vector<16x1xi1>
    %15 = vector.broadcast %3 : i32 to vector<16x1xi32>
    %16 = arith.addi %5, %15 : vector<16x1xi32>
    %17 = arith.select %14, %16, %5 : vector<16x1xi1>, vector<16x1xi32>
    %c0_i32_4 = arith.constant 0 : i32
    %18 = vector.broadcast %c0_i32_4 : i32 to vector<16x1xi32>
    %19 = arith.cmpi ne, %17, %18 : vector<16x1xi32>
    %c16_i32_5 = arith.constant 16 : i32
    %c0_i32_6 = arith.constant 0 : i32
    %20 = arith.cmpi eq, %c16_i32_5, %c0_i32_6 : i32
    %c1_i32_7 = arith.constant 1 : i32
    %21 = arith.select %20, %c1_i32_7, %c16_i32_5 : i32
    %22 = vector.broadcast %21 : i32 to vector<16x1xi32>
    %23 = arith.remsi %1, %22 : vector<16x1xi32>
    %c0_i32_8 = arith.constant 0 : i32
    %24 = vector.broadcast %c0_i32_8 : i32 to vector<16x1xi32>
    %25 = arith.cmpi ne, %23, %24 : vector<16x1xi32>
    %c0_i32_9 = arith.constant 0 : i32
    %26 = vector.broadcast %c0_i32_9 : i32 to vector<16x1xi32>
    %27 = arith.cmpi slt, %23, %26 : vector<16x1xi32>
    %c0_i32_10 = arith.constant 0 : i32
    %28 = arith.cmpi slt, %21, %c0_i32_10 : i32
    %29 = vector.broadcast %28 : i1 to vector<16x1xi1>
    %30 = vector.broadcast %29 : vector<16x1xi1> to vector<16x1xi1>
    %31 = arith.xori %27, %30 : vector<16x1xi1>
    %32 = arith.andi %31, %25 : vector<16x1xi1>
    %33 = vector.broadcast %21 : i32 to vector<16x1xi32>
    %34 = arith.addi %23, %33 : vector<16x1xi32>
    %35 = arith.select %32, %34, %23 : vector<16x1xi1>, vector<16x1xi32>
    %c15_i32 = arith.constant 15 : i32
    %36 = vector.broadcast %c15_i32 : i32 to vector<16x1xi32>
    %37 = arith.cmpi ne, %35, %36 : vector<16x1xi32>
    %38 = arith.truncf %0 : vector<16x128xf32> to vector<16x128xbf16>
    %c0_11 = arith.constant 0 : index
    %c0_12 = arith.constant 0 : index
    %c0_13 = arith.constant 0 : index
    %39 = vector.load %arg2[%c0_11, %c0_12, %c0_13] : memref<3x128x128xbf16, #tpu.memory_space<vmem>>, vector<1x128x128xbf16>
    %40 = vector.shape_cast %39 : vector<1x128x128xbf16> to vector<128x128xbf16>
    %cst = arith.constant dense<0.000000e+00> : vector<16x128xf32>
    %41 = tpu.matmul %38, %40, %cst {dimension_numbers = #tpu.dot_dimension_numbers<[1], [0], [0], [1], [0, 0, 1, 1], [], []>} : vector<16x128xbf16>, vector<128x128xbf16>, vector<16x128xf32> -> vector<16x128xf32>
    %c1 = arith.constant 1 : index
    %c0_14 = arith.constant 0 : index
    %c0_15 = arith.constant 0 : index
    %42 = vector.load %arg2[%c1, %c0_14, %c0_15] : memref<3x128x128xbf16, #tpu.memory_space<vmem>>, vector<1x128x128xbf16>
    %43 = vector.shape_cast %42 : vector<1x128x128xbf16> to vector<128x128xbf16>
    %cst_16 = arith.constant dense<0.000000e+00> : vector<16x128xf32>
    %44 = tpu.matmul %38, %43, %cst_16 {dimension_numbers = #tpu.dot_dimension_numbers<[1], [0], [0], [1], [0, 0, 1, 1], [], []>} : vector<16x128xbf16>, vector<128x128xbf16>, vector<16x128xf32> -> vector<16x128xf32>
    %c2 = arith.constant 2 : index
    %c0_17 = arith.constant 0 : index
    %c0_18 = arith.constant 0 : index
    %45 = vector.load %arg2[%c2, %c0_17, %c0_18] : memref<3x128x128xbf16, #tpu.memory_space<vmem>>, vector<1x128x128xbf16>
    %46 = vector.shape_cast %45 : vector<1x128x128xbf16> to vector<128x128xbf16>
    %cst_19 = arith.constant dense<0.000000e+00> : vector<16x128xf32>
    %47 = tpu.matmul %38, %46, %cst_19 {dimension_numbers = #tpu.dot_dimension_numbers<[1], [0], [0], [1], [0, 0, 1, 1], [], []>} : vector<16x128xbf16>, vector<128x128xbf16>, vector<16x128xf32> -> vector<16x128xf32>
    %c0_20 = arith.constant 0 : index
    %c0_21 = arith.constant 0 : index
    %48 = vector.load %arg3[%c0_20, %c0_21] : memref<1x128xf32, #tpu.memory_space<vmem>>, vector<1x128xf32>
    %49 = vector.broadcast %48 : vector<1x128xf32> to vector<16x128xf32>
    %50 = arith.addf %44, %49 : vector<16x128xf32>
    %c1_i32_22 = arith.constant 1 : i32
    %51 = tpu.dynamic_rotate %41 by %c1_i32_22 dim 0 : vector<16x128xf32>, i32 -> vector<16x128xf32>
    %cst_23 = arith.constant 0.000000e+00 : f32
    %52 = vector.shape_cast %19 : vector<16x1xi1> to vector<16x1xi1>
    %53 = vector.broadcast %52 : vector<16x1xi1> to vector<16x128xi1>
    %54 = vector.broadcast %cst_23 : f32 to vector<16x128xf32>
    %55 = arith.select %53, %51, %54 : vector<16x128xi1>, vector<16x128xf32>
    %56 = arith.addf %50, %55 : vector<16x128xf32>
    %c15_i32_24 = arith.constant 15 : i32
    %57 = tpu.dynamic_rotate %47 by %c15_i32_24 dim 0 : vector<16x128xf32>, i32 -> vector<16x128xf32>
    %cst_25 = arith.constant 0.000000e+00 : f32
    %58 = vector.shape_cast %37 : vector<16x1xi1> to vector<16x1xi1>
    %59 = vector.broadcast %58 : vector<16x1xi1> to vector<16x128xi1>
    %60 = vector.broadcast %cst_25 : f32 to vector<16x128xf32>
    %61 = arith.select %59, %57, %60 : vector<16x128xi1>, vector<16x128xf32>
    %62 = arith.addf %56, %61 : vector<16x128xf32>
    %63 = arith.negf %62 : vector<16x128xf32>
    %64 = math.exp %63 : vector<16x128xf32>
    %cst_26 = arith.constant 1.000000e+00 : f32
    %65 = vector.broadcast %cst_26 : f32 to vector<16x128xf32>
    %66 = arith.addf %65, %64 : vector<16x128xf32>
    %67 = arith.divf %65, %66 : vector<16x128xf32>
    %68 = arith.mulf %62, %67 : vector<16x128xf32>
    %69 = arith.truncf %68 : vector<16x128xf32> to vector<16x128xbf16>
    %c0_27 = arith.constant 0 : index
    %c0_28 = arith.constant 0 : index
    %c0_29 = arith.constant 0 : index
    %70 = vector.load %arg4[%c0_27, %c0_28, %c0_29] : memref<3x128x128xbf16, #tpu.memory_space<vmem>>, vector<1x128x128xbf16>
    %71 = vector.shape_cast %70 : vector<1x128x128xbf16> to vector<128x128xbf16>
    %cst_30 = arith.constant dense<0.000000e+00> : vector<16x128xf32>
    %72 = tpu.matmul %69, %71, %cst_30 {dimension_numbers = #tpu.dot_dimension_numbers<[1], [0], [0], [1], [0, 0, 1, 1], [], []>} : vector<16x128xbf16>, vector<128x128xbf16>, vector<16x128xf32> -> vector<16x128xf32>
    %c1_31 = arith.constant 1 : index
    %c0_32 = arith.constant 0 : index
    %c0_33 = arith.constant 0 : index
    %73 = vector.load %arg4[%c1_31, %c0_32, %c0_33] : memref<3x128x128xbf16, #tpu.memory_space<vmem>>, vector<1x128x128xbf16>
    %74 = vector.shape_cast %73 : vector<1x128x128xbf16> to vector<128x128xbf16>
    %cst_34 = arith.constant dense<0.000000e+00> : vector<16x128xf32>
    %75 = tpu.matmul %69, %74, %cst_34 {dimension_numbers = #tpu.dot_dimension_numbers<[1], [0], [0], [1], [0, 0, 1, 1], [], []>} : vector<16x128xbf16>, vector<128x128xbf16>, vector<16x128xf32> -> vector<16x128xf32>
    %c2_35 = arith.constant 2 : index
    %c0_36 = arith.constant 0 : index
    %c0_37 = arith.constant 0 : index
    %76 = vector.load %arg4[%c2_35, %c0_36, %c0_37] : memref<3x128x128xbf16, #tpu.memory_space<vmem>>, vector<1x128x128xbf16>
    %77 = vector.shape_cast %76 : vector<1x128x128xbf16> to vector<128x128xbf16>
    %cst_38 = arith.constant dense<0.000000e+00> : vector<16x128xf32>
    %78 = tpu.matmul %69, %77, %cst_38 {dimension_numbers = #tpu.dot_dimension_numbers<[1], [0], [0], [1], [0, 0, 1, 1], [], []>} : vector<16x128xbf16>, vector<128x128xbf16>, vector<16x128xf32> -> vector<16x128xf32>
    %c0_39 = arith.constant 0 : index
    %c0_40 = arith.constant 0 : index
    %79 = vector.load %arg5[%c0_39, %c0_40] : memref<1x128xf32, #tpu.memory_space<vmem>>, vector<1x128xf32>
    %80 = vector.broadcast %79 : vector<1x128xf32> to vector<16x128xf32>
    %81 = arith.addf %75, %80 : vector<16x128xf32>
    %c1_i32_41 = arith.constant 1 : i32
    %82 = tpu.dynamic_rotate %72 by %c1_i32_41 dim 0 : vector<16x128xf32>, i32 -> vector<16x128xf32>
    %cst_42 = arith.constant 0.000000e+00 : f32
    %83 = vector.shape_cast %19 : vector<16x1xi1> to vector<16x1xi1>
    %84 = vector.broadcast %83 : vector<16x1xi1> to vector<16x128xi1>
    %85 = vector.broadcast %cst_42 : f32 to vector<16x128xf32>
    %86 = arith.select %84, %82, %85 : vector<16x128xi1>, vector<16x128xf32>
    %87 = arith.addf %81, %86 : vector<16x128xf32>
    %c15_i32_43 = arith.constant 15 : i32
    %88 = tpu.dynamic_rotate %78 by %c15_i32_43 dim 0 : vector<16x128xf32>, i32 -> vector<16x128xf32>
    %cst_44 = arith.constant 0.000000e+00 : f32
    %89 = vector.shape_cast %37 : vector<16x1xi1> to vector<16x1xi1>
    %90 = vector.broadcast %89 : vector<16x1xi1> to vector<16x128xi1>
    %91 = vector.broadcast %cst_44 : f32 to vector<16x128xf32>
    %92 = arith.select %90, %88, %91 : vector<16x128xi1>, vector<16x128xf32>
    %93 = arith.addf %87, %92 : vector<16x128xf32>
    %94 = arith.negf %93 : vector<16x128xf32>
    %95 = math.exp %94 : vector<16x128xf32>
    %cst_45 = arith.constant 1.000000e+00 : f32
    %96 = vector.broadcast %cst_45 : f32 to vector<16x128xf32>
    %97 = arith.addf %96, %95 : vector<16x128xf32>
    %98 = arith.divf %96, %97 : vector<16x128xf32>
    %99 = arith.mulf %93, %98 : vector<16x128xf32>
    %100 = arith.addf %99, %0 : vector<16x128xf32>
    %c0_46 = arith.constant 0 : index
    %c0_47 = arith.constant 0 : index
    %101 = vector.load %arg6[%c0_46, %c0_47] : memref<16x128xf32, #tpu.memory_space<vmem>>, vector<16x128xf32>
    tpu.vector_store %arg6[%c0_46, %c0_47], %100 {strides = array<i32>} : memref<16x128xf32, #tpu.memory_space<vmem>>, vector<16x128xf32>,
    return
  }
  func.func @transform_0(%arg0: i32) -> (i32, i32) {
    %c0_i32 = arith.constant 0 : i32
    %c0_i32_0 = arith.constant 0 : i32
    return %arg0, %c0_i32 : i32, i32
  }
  func.func @transform_1(%arg0: i32) -> (i32, i32, i32) {
    %c0_i32 = arith.constant 0 : i32
    %c0_i32_0 = arith.constant 0 : i32
    %c0_i32_1 = arith.constant 0 : i32
    %c0_i32_2 = arith.constant 0 : i32
    return %c0_i32, %c0_i32_0, %c0_i32_1 : i32, i32, i32
  }
  func.func @transform_2(%arg0: i32) -> (i32, i32) {
    %c0_i32 = arith.constant 0 : i32
    %c0_i32_0 = arith.constant 0 : i32
    %c0_i32_1 = arith.constant 0 : i32
    return %c0_i32, %c0_i32_0 : i32, i32
  }
  func.func @transform_3(%arg0: i32) -> (i32, i32, i32) {
    %c0_i32 = arith.constant 0 : i32
    %c0_i32_0 = arith.constant 0 : i32
    %c0_i32_1 = arith.constant 0 : i32
    %c0_i32_2 = arith.constant 0 : i32
    return %c0_i32, %c0_i32_0, %c0_i32_1 : i32, i32, i32
  }
  func.func @transform_4(%arg0: i32) -> (i32, i32) {
    %c0_i32 = arith.constant 0 : i32
    %c0_i32_0 = arith.constant 0 : i32
    %c0_i32_1 = arith.constant 0 : i32
    return %c0_i32, %c0_i32_0 : i32, i32
  }
  func.func @transform_5(%arg0: i32) -> (i32, i32) {
    %c0_i32 = arith.constant 0 : i32
    %c0_i32_0 = arith.constant 0 : i32
    return %arg0, %c0_i32 : i32, i32
  }
}

</mosaic_0001>

<bundles_post_ra>
// kernel: rep_bottleneck_pallas.1
= control target key start
LH: loop header
LB: loop body
LE: loop exit
PB: predicated region body
PF: predicated region fallthrough
CT: control target
= control target key end

     0   :  { %s1459_s18 = smov 0   ;;  %s1739_s0 = inlined_call_operand.vmem [shape: f32[32,128], index: 0, kind: input, shape index: {}]   ;;  %s1740_s1 = inlined_call_operand.vmem [shape: bf16[3,128,128], index: 1, kind: input, shape index: {}]   ;;  %s1741_s2 = inlined_call_operand.vmem [shape: f32[1,128], index: 2, kind: input, shape index: {}]   ;;  %s1742_s3 = inlined_call_operand.vmem [shape: bf16[3,128,128], index: 3, kind: input, shape index: {}]   ;;  %s1743_s4 = inlined_call_operand.vmem [shape: f32[1,128], index: 4, kind: input, shape index: {}]   ;;  %s1744_s5 = inlined_call_operand.vmem [shape: f32[32,128], index: 5, kind: output, shape index: {}]  }
   0x1 LB: > { %s1042_s19 = sadd.s32 4294967295, %s1425_s18   ;;  %p1046_p0 = scmp.ge.s32.totalorder %s1425_s18, 1  ;;  %s1425_s18 = sphi %s1459_s18, %s15_s18  }
   0x2   : > { %p188_p1 = scmp.lt.s32.totalorder %s1425_s18, 3 }
   0x4   : > { %p189_p2 = pnand %p1046_p0, %p188_p1 }
   0x5   : > { %v1355_v0 = vld [vmem:[%s1740_s1] sm:$0xff] (!%p189_p2)   ;;  %v1427_v1 = vmov (!%p189_p2), 0.0   ;;  %v1356_v2 = vld [vmem:[%s1740_s1 + $0x8] sm:$0xff] (!%p189_p2)   ;;  %vm1428_vm0 = vmmov (!%p189_p2), 0   ;;  %v1357_v3 = vld [vmem:[%s1740_s1 + $0x10] sm:$0xff] (!%p189_p2)   ;;  %s1047_s26 = sshll.u32 (!%p189_p2), %s1042_s19, 1  ;;  %v231_v44 = vlaneseq (!%p189_p2) }
   0x6   : > { %192 = sbr.rel (%p189_p2) target bundleno = 603 (0x25b), region = 40  ;;  %1225 = vmatprep.subr.bf16.mxu0 (!%p189_p2), %v1427_v1  ;;  %1245 = vmatprep.subr.bf16.mxu1 (!%p189_p2), %v1427_v1  ;;  %v1363_v4 = vld [vmem:[%s1740_s1 + $0x80] sm:$0xff] (!%p189_p2)   ;;  %v1358_v5 = vld [vmem:[%s1740_s1 + $0x18] sm:$0xff] (!%p189_p2)   ;;  %p217_p3 = scmp.lt.s32.totalorder (!%p189_p2), %s1047_s26, 3  ;;  %v1365_v6 = vld [vmem:[%s1740_s1 + $0x88] sm:$0xff] (!%p189_p2)  }
   0x7   : > { %1226 = vmatpush3.bf16.msra.mxu0 (!%p189_p2), %v1355_v0  ;;  %1241 = vmatprep.mubr.msk.bf16.mxu0 (!%p189_p2), %vm1428_vm0, %v1427_v1  ;;  %v1359_v7 = vld [vmem:[%s1740_s1 + $0x20] sm:$0xff] (!%p189_p2)   ;;  %v1367_v8 = vld [vmem:[%s1740_s1 + $0x90] sm:$0xff] (!%p189_p2)   ;;  %v1360_v9 = vld [vmem:[%s1740_s1 + $0x28] sm:$0xff] (!%p189_p2)   ;;  %v1652_v45 = vshrl.u32 (!%p189_p2), %v231_v44, 7 }
   0x8   : > { %1227 = vmatprep.subr.bf16.mxu0 (!%p189_p2), %v1427_v1  ;;  %1261 = vmatprep.mubr.msk.bf16.mxu1 (!%p189_p2), %vm1428_vm0, %v1427_v1  ;;  %v1369_v10 = vld [vmem:[%s1740_s1 + $0x98] sm:$0xff] (!%p189_p2)   ;;  %v1361_v11 = vld [vmem:[%s1740_s1 + $0x30] sm:$0xff] (!%p189_p2)   ;;  %v1371_v12 = vld [vmem:[%s1740_s1 + $0xa0] sm:$0xff] (!%p189_p2)  }
   0x9   : > { %1246 = vmatpush3.bf16.msra.mxu1 (!%p189_p2), %v1363_v4  ;;  %v1362_v13 = vld [vmem:[%s1740_s1 + $0x38] sm:$0xff] (!%p189_p2)   ;;  %v1373_v16 = vld [vmem:[%s1740_s1 + $0xa8] sm:$0xff] (!%p189_p2)   ;;  %v1364_v17 = vld [vmem:[%s1740_s1 + $0x40] sm:$0xff] (!%p189_p2)   ;;  %vm589_vm1 = vcmp.lt.s32.totalorder (!%p189_p2), %v1652_v45, 1  ;;  %vm602_vm2 = vcmp.lt.s32.totalorder (!%p189_p2), %v1652_v45, 7  ;;  %v238_v62 = vand.u32 (!%p189_p2), 15, %v1652_v45 }
   0xa   : > { %1247 = vmatprep.subr.bf16.mxu1 (!%p189_p2), %v1427_v1  ;;  %v1375_v18 = vld [vmem:[%s1740_s1 + $0xb0] sm:$0xff] (!%p189_p2)   ;;  %v1366_v20 = vld [vmem:[%s1740_s1 + $0x48] sm:$0xff] (!%p189_p2)   ;;  %v1377_v21 = vld [vmem:[%s1740_s1 + $0xb8] sm:$0xff] (!%p189_p2)   ;;  %v233_v63 = vadd.s32 (!%p189_p2), 8, %v1652_v45 }
   0xb   : > { %1228 = vmatpush3.bf16.msra.mxu0 (!%p189_p2), %v1356_v2  ;;  %v1368_v22 = vld [vmem:[%s1740_s1 + $0x50] sm:$0xff] (!%p189_p2)   ;;  %v1370_v23 = vld [vmem:[%s1740_s1 + $0x58] sm:$0xff] (!%p189_p2)   ;;  %v1372_v24 = vld [vmem:[%s1740_s1 + $0x60] sm:$0xff] (!%p189_p2)   ;;  %vm1669_vm3 = vcmp.ne.s32.totalorder (!%p189_p2), %v238_v62, 0 }
   0xc   : > { %1229 = vmatprep.subr.bf16.mxu0 (!%p189_p2), %v1427_v1  ;;  %v1374_v25 = vld [vmem:[%s1740_s1 + $0x68] sm:$0xff] (!%p189_p2)   ;;  %v1376_v26 = vld [vmem:[%s1740_s1 + $0x70] sm:$0xff] (!%p189_p2)   ;;  %v1378_v27 = vld [vmem:[%s1740_s1 + $0x78] sm:$0xff] (!%p189_p2)  }
   0xd   : > { %s1750_s26 = smov (!%p217_p3, %s1047_s26), 3  ;;  %1248 = vmatpush3.bf16.msra.mxu1 %v1365_v6  ;;  %v1379_v28 = vld [vmem:[%s1742_s3] sm:$0xff]   ;;  %v1381_v30 = vld [vmem:[%s1742_s3 + $0x8] sm:$0xff]   ;;  %v1383_v32 = vld [vmem:[%s1742_s3 + $0x10] sm:$0xff]  }
   0xe   : > { %1249 = vmatprep.subr.bf16.mxu1 %v1427_v1  ;;  %s1048_s14 = sshll.u32 %s1750_s26, 3  ;;  %v1380_v29 = vld [vmem:[%s1742_s3 + $0x80] sm:$0xff]   ;;  %v1382_v31 = vld [vmem:[%s1742_s3 + $0x88] sm:$0xff]   ;;  %v1384_v33 = vld [vmem:[%s1742_s3 + $0x90] sm:$0xff]  }
   0xf   : > { %1230 = vmatpush3.bf16.msra.mxu0 %v1357_v3  ;;  %s220_s22 = scalar_lea.vmem %s1739_s0, %s1048_s14  ;;  %v1385_v34 = vld [vmem:[%s1742_s3 + $0x18] sm:$0xff]   ;;  %v1387_v36 = vld [vmem:[%s1742_s3 + $0x20] sm:$0xff]   ;;  %v1389_v38 = vld [vmem:[%s1742_s3 + $0x28] sm:$0xff]   ;;  %v245_v3 = vand.u32 15, %v233_v63  ;;  %s226_s13 = scalar_lea.vmem %s1744_s5, %s1048_s14 }
  0x10   : > { %1231 = vmatprep.subr.bf16.mxu0 %v1427_v1  ;;  %v1530_v14 = vld [vmem:[%s220_s22] sm:$0xff]  ;;  %v1532_v15 = vld [vmem:[%s220_s22 + $0x8] sm:$0xff]  ;;  %v1386_v35 = vld [vmem:[%s1742_s3 + $0x98] sm:$0xff]  }
  0x11   : > { %1250 = vmatpush3.bf16.msra.mxu1 %v1367_v8  ;;  %v262_v19 = vpack.c.bf16 %v1532_v15, %v1530_v14  ;;  %v1388_v37 = vld [vmem:[%s1742_s3 + $0xa0] sm:$0xff]   ;;  %v1390_v39 = vld [vmem:[%s1742_s3 + $0xa8] sm:$0xff]   ;;  %v1391_v40 = vld [vmem:[%s1742_s3 + $0x30] sm:$0xff]   ;;  %vm1675_vm4 = vcmp.ne.s32.totalorder %v245_v3, 15 }
  0x12   : > { %1251 = vmatprep.subr.bf16.mxu1 %v1427_v1  ;;  %v1392_v41 = vld [vmem:[%s1742_s3 + $0xb0] sm:$0xff]   ;;  %v1393_v42 = vld [vmem:[%s1742_s3 + $0x38] sm:$0xff]   ;;  %v1099_v0 = vld [vmem:[%s1741_s2] ss:$0 sm:$0xff] }
  0x13   : > { %1232 = vmatpush3.bf16.msra.mxu0 %v1358_v5  ;;  %v1394_v43 = vld [vmem:[%s1742_s3 + $0xb8] sm:$0xff]  }
  0x14   : > { %1233 = vmatprep.subr.bf16.mxu0 %v1427_v1 }
  0x15   : > { %1252 = vmatpush3.bf16.msra.mxu1 %v1369_v10 }
  0x16   : > { %1253 = vmatprep.subr.bf16.mxu1 %v1427_v1 }
  0x17   : > { %1234 = vmatpush3.bf16.msra.mxu0 %v1359_v7 }
  0x18   : > { %1235 = vmatprep.subr.bf16.mxu0 %v1427_v1 }
  0x19   : > { %1254 = vmatpush3.bf16.msra.mxu1 %v1371_v12 }
  0x1a   : > { %1255 = vmatprep.subr.bf16.mxu1 %v1427_v1 }
  0x1b   : > { %1236 = vmatpush3.bf16.msra.mxu0 %v1360_v9 }
  0x1c   : > { %1237 = vmatprep.subr.bf16.mxu0 %v1427_v1 }
  0x1d   : > { %1256 = vmatpush3.bf16.msra.mxu1 %v1373_v16 }
  0x1e   : > { %1257 = vmatprep.subr.bf16.mxu1 %v1427_v1 }
  0x1f   : > { %1238 = vmatpush3.bf16.msra.mxu0 %v1361_v11 }
  0x20   : > { %1239 = vmatprep.subr.bf16.mxu0 %v1427_v1 }
  0x21   : > { %1258 = vmatpush3.bf16.msra.mxu1 %v1375_v18 }
  0x22   : > { %1259 = vmatprep.subr.bf16.mxu1 %v1427_v1 }
  0x23   : > { %1240 = vmatpush3.bf16.msra.mxu0 %v1362_v13 }
  0x24   : > { %1265 = vmatprep.subr.bf16.mxu0 %v1427_v1 }
  0x25   : > { %1260 = vmatpush3.bf16.msra.mxu1 %v1377_v21 }
  0x26   : > { %1242 = vmatmul.mubr.bf16.vlgmr.msra.gmra.mrb[0].mxu0 %v262_v19  ;;  %1285 = vmatprep.subr.bf16.mxu1 %v1427_v1 }
  0x27   : > { %1266 = vmatpush3.bf16.msra.mxu0 %v1364_v17  ;;  %1281 = vmatprep.mubr.msk.bf16.mxu0 %vm1428_vm0, %v1427_v1 }
  0x28   : > { %1267 = vmatprep.subr.bf16.mxu0 %v1427_v1  ;;  %1262 = vmatmul.mubr.bf16.vlgmr.msra.gmra.mrb[0].mxu1 %v262_v19 }
  0x29   : > { %1301 = vmatprep.mubr.msk.bf16.mxu1 %vm1428_vm0, %v1427_v1  ;;  %1286 = vmatpush3.bf16.msra.mxu1 %v1379_v28 }
  0x2a   : > { %1287 = vmatprep.subr.bf16.mxu1 %v1427_v1 }
  0x2b   : > { %1268 = vmatpush3.bf16.msra.mxu0 %v1366_v20 }
  0x2c   : > { %1269 = vmatprep.subr.bf16.mxu0 %v1427_v1 }
  0x2d   : > { %1288 = vmatpush3.bf16.msra.mxu1 %v1381_v30 }
  0x2e   : > { %1289 = vmatprep.subr.bf16.mxu1 %v1427_v1 }
  0x2f   : > { %1270 = vmatpush3.bf16.msra.mxu0 %v1368_v22 }
  0x30   : > { %1271 = vmatprep.subr.bf16.mxu0 %v1427_v1 }
  0x31   : > { %1290 = vmatpush3.bf16.msra.mxu1 %v1383_v32  ;;  %v1397_v32 = vld [vmem:[%s1742_s3 + $0x50] sm:$0xff]  }
  0x32   : > { %1291 = vmatprep.subr.bf16.mxu1 %v1427_v1 }
  0x33   : > { %1272 = vmatpush3.bf16.msra.mxu0 %v1370_v23 }
  0x34   : > { %1273 = vmatprep.subr.bf16.mxu0 %v1427_v1 }
  0x35   : > { %1292 = vmatpush3.bf16.msra.mxu1 %v1385_v34  ;;  %v1399_v34 = vld [vmem:[%s1742_s3 + $0x60] sm:$0xff]  }
  0x36   : > { %1293 = vmatprep.subr.bf16.mxu1 %v1427_v1 }
  0x37   : > { %1274 = vmatpush3.bf16.msra.mxu0 %v1372_v24 }
  0x38   : > { %1275 = vmatprep.subr.bf16.mxu0 %v1427_v1 }
  0x39   : > { %1294 = vmatpush3.bf16.msra.mxu1 %v1387_v36  ;;  %v1401_v36 = vld [vmem:[%s1742_s3 + $0x70] sm:$0xff]  }
  0x3a   : > { %1295 = vmatprep.subr.bf16.mxu1 %v1427_v1 }
  0x3b   : > { %1276 = vmatpush3.bf16.msra.mxu0 %v1374_v25 }
  0x3c   : > { %1277 = vmatprep.subr.bf16.mxu0 %v1427_v1 }
  0x3d   : > { %1296 = vmatpush3.bf16.msra.mxu1 %v1389_v38 }
  0x3e   : > { %1297 = vmatprep.subr.bf16.mxu1 %v1427_v1 }
  0x3f   : > { %1278 = vmatpush3.bf16.msra.mxu0 %v1376_v26 }
  0x40   : > { %1279 = vmatprep.subr.bf16.mxu0 %v1427_v1 }
  0x41   : > { %1298 = vmatpush3.bf16.msra.mxu1 %v1391_v40 }
  0x42   : > { %1299 = vmatprep.subr.bf16.mxu1 %v1427_v1 }
  0x43   : > { %1280 = vmatpush3.bf16.msra.mxu0 %v1378_v27 }
  0x44   : > { %1305 = vmatprep.subr.bf16.mxu0 %v1427_v1 }
  0x45   : > { %1300 = vmatpush3.bf16.msra.mxu1 %v1393_v42 }
  0x46   : > { %1282 = vmatmul.mubr.bf16.vlgmr.msra.gmra.mrb[4].mxu0 %v262_v19  ;;  %1325 = vmatprep.subr.bf16.mxu1 %v1427_v1 }
  0x47   : > { %1321 = vmatprep.mubr.msk.bf16.mxu0 %vm1428_vm0, %v1427_v1  ;;  %1306 = vmatpush3.bf16.msra.mxu0 %v1380_v29  ;;  %v1395_v29 = vld [vmem:[%s1742_s3 + $0x40] sm:$0xff]  }
  0x48   : > { %1307 = vmatprep.subr.bf16.mxu0 %v1427_v1 }
  0x4b   : > { %1308 = vmatpush3.bf16.msra.mxu0 %v1382_v31  ;;  %v1396_v31 = vld [vmem:[%s1742_s3 + $0x48] sm:$0xff]  }
  0x4c   : > { %1309 = vmatprep.subr.bf16.mxu0 %v1427_v1 }
  0x4f   : > { %1310 = vmatpush3.bf16.msra.mxu0 %v1384_v33  ;;  %v1398_v33 = vld [vmem:[%s1742_s3 + $0x58] sm:$0xff]  }
  0x50   : > { %1311 = vmatprep.subr.bf16.mxu0 %v1427_v1 }
  0x53   : > { %1312 = vmatpush3.bf16.msra.mxu0 %v1386_v35  ;;  %v1400_v35 = vld [vmem:[%s1742_s3 + $0x68] sm:$0xff]  }
  0x54   : > { %1313 = vmatprep.subr.bf16.mxu0 %v1427_v1 }
  0x57   : > { %1314 = vmatpush3.bf16.msra.mxu0 %v1388_v37  ;;  %v1402_v37 = vld [vmem:[%s1742_s3 + $0x78] sm:$0xff]  }
  0x58   : > { %1315 = vmatprep.subr.bf16.mxu0 %v1427_v1 }
  0x5b   : > { %1316 = vmatpush3.bf16.msra.mxu0 %v1390_v39 }
  0x5c   : > { %1317 = vmatprep.subr.bf16.mxu0 %v1427_v1 }
  0x5f   : > { %1318 = vmatpush3.bf16.msra.mxu0 %v1392_v41 }
  0x60   : > { %1319 = vmatprep.subr.bf16.mxu0 %v1427_v1 }
  0x63   : > { %1320 = vmatpush3.bf16.msra.mxu0 %v1394_v43 }
  0xf9   : > { %v361_v46 = vpop.f32.mrb[0].mxu0 }
  0xfa   : > { %v587_v47 = vrot.slane %v361_v46, 7  ;;  %v1243_v48 = vpop.f32.mrb[1].mxu0 }
  0xfb   : > { %v364_v49 = vpop.f32.mrb[2].mxu0  ;;  %v484_v54 = vpop.f32.mrb[0].mxu1 }
  0xfc   : > { %v588_v50 = vrot.slane %v364_v49, 7  ;;  %v1244_v51 = vpop.f32.mrb[3].mxu0  ;;  %v600_v55 = vrot.slane %v484_v54, 1  ;;  %v1263_v56 = vpop.f32.mrb[1].mxu1  ;;  %v1158_v54 = vld [vmem:[%s1743_s4] ss:$0 sm:$0xff] }
  0xfd   : > { %v487_v57 = vpop.f32.mrb[2].mxu1 }
  0xfe   : > { %v591_v52 = vsel %vm589_vm1, %v588_v50, %v587_v47  ;;  %v590_v53 = vsel %vm589_vm1, %v587_v47, %v588_v50  ;;  %v601_v58 = vrot.slane %v487_v57, 1  ;;  %v1264_v59 = vpop.f32.mrb[3].mxu1 }
  0xff   : > { %v596_v7 = vsel %vm1669_vm3, %v591_v52, 0.0 }
 0x100   : > { %v603_v60 = vsel %vm602_vm2, %v600_v55, %v601_v58  ;;  %v604_v61 = vsel %vm602_vm2, %v601_v58, %v600_v55 }
 0x101   : > { %v610_v17 = vsel %vm1675_vm4, %v604_v61, 0.0 }
 0x119   : > { %v580_v4 = vpop.f32.mrb[4].mxu0 }
 0x11a   : > { %v581_v5 = vadd.f32 %v1099_v0, %v580_v4  ;;  %v1283_v6 = vpop.f32.mrb[5].mxu0 }
 0x11b   : > { %v583_v8 = vpop.f32.mrb[6].mxu0 }
 0x11c   : > { %v598_v9 = vadd.f32 %v596_v7, %v581_v5  ;;  %v584_v11 = vadd.f32 %v1099_v0, %v583_v8  ;;  %v1284_v12 = vpop.f32.mrb[7].mxu0 }
 0x11e   : > { %v611_v13 = vadd.f32 %v603_v60, %v598_v9  ;;  %v599_v16 = vadd.f32 %v590_v53, %v584_v11 }
 0x120   : > { %v1108_v18 = vmul.f32 -1.442695, %v611_v13  ;;  %v612_v19 = vadd.f32 %v610_v17, %v599_v16 }
 0x122   : > { %1403 = vpow2.f32 %v1108_v18  ;;  %v1109_v20 = vmul.f32 -1.442695, %v612_v19 }
 0x124   : > { %1405 = vpow2.f32 %v1109_v20 }
 0x12c   : > { %v1404_v21 = vpop.eup %1403 }
 0x12d   : > { %v619_v22 = vadd.f32 1.0, %v1404_v21 }
 0x12e   : > { %v1406_v23 = vpop.eup %1405 }
 0x12f   : > { %1407 = vrcp.f32 %v619_v22  ;;  %v620_v24 = vadd.f32 1.0, %v1406_v23 }
 0x131   : > { %1409 = vrcp.f32 %v620_v24 }
 0x139   : > { %v1408_v25 = vpop.eup %1407 }
 0x13a   : > { %v625_v27 = vmul.f32 %v1408_v25, %v611_v13 }
 0x13b   : > { %v1410_v26 = vpop.eup %1409 }
 0x13c   : > { %v626_v28 = vmul.f32 %v1410_v26, %v612_v19 }
 0x13e   : > { %v627_v30 = vpack.c.bf16 %v626_v28, %v625_v27 }
 0x140   : > { %1302 = vmatmul.mubr.bf16.vlgmr.msra.gmra.mrb[4].mxu1 %v627_v30  ;;  %1322 = vmatmul.mubr.bf16.vlgmr.msra.gmra.mrb[8].mxu0 %v627_v30 }
 0x141   : > { %1326 = vmatpush3.bf16.msra.mxu1 %v1395_v29  ;;  %1341 = vmatprep.mubr.msk.bf16.mxu1 %vm1428_vm0, %v1427_v1 }
 0x142   : > { %1327 = vmatprep.subr.bf16.mxu1 %v1427_v1 }
 0x145   : > { %1328 = vmatpush3.bf16.msra.mxu1 %v1396_v31 }
 0x146   : > { %1329 = vmatprep.subr.bf16.mxu1 %v1427_v1 }
 0x149   : > { %1330 = vmatpush3.bf16.msra.mxu1 %v1397_v32 }
 0x14a   : > { %1331 = vmatprep.subr.bf16.mxu1 %v1427_v1 }
 0x14d   : > { %1332 = vmatpush3.bf16.msra.mxu1 %v1398_v33 }
 0x14e   : > { %1333 = vmatprep.subr.bf16.mxu1 %v1427_v1 }
 0x151   : > { %1334 = vmatpush3.bf16.msra.mxu1 %v1399_v34 }
 0x152   : > { %1335 = vmatprep.subr.bf16.mxu1 %v1427_v1 }
 0x155   : > { %1336 = vmatpush3.bf16.msra.mxu1 %v1400_v35 }
 0x156   : > { %1337 = vmatprep.subr.bf16.mxu1 %v1427_v1 }
 0x159   : > { %1338 = vmatpush3.bf16.msra.mxu1 %v1401_v36 }
 0x15a   : > { %1339 = vmatprep.subr.bf16.mxu1 %v1427_v1 }
 0x15d   : > { %1340 = vmatpush3.bf16.msra.mxu1 %v1402_v37 }
 0x160   : > { %1342 = vmatmul.mubr.bf16.vlgmr.msra.gmra.mrb[8].mxu1 %v627_v30 }
 0x213   : > { %v726_v38 = vpop.f32.mrb[4].mxu1  ;;  %v849_v39 = vpop.f32.mrb[8].mxu0 }
 0x214   : > { %v1303_v40 = vpop.f32.mrb[5].mxu1  ;;  %v1323_v41 = vpop.f32.mrb[9].mxu0  ;;  %v952_v44 = vrot.slane %v726_v38, 7  ;;  %v960_v46 = vrot.slane %v849_v39, 1 }
 0x215   : > { %v729_v42 = vpop.f32.mrb[6].mxu1  ;;  %v852_v43 = vpop.f32.mrb[10].mxu0 }
 0x216   : > { %v953_v47 = vrot.slane %v729_v42, 7  ;;  %v961_v48 = vrot.slane %v852_v43, 1  ;;  %v1304_v49 = vpop.f32.mrb[7].mxu1  ;;  %v1324_v50 = vpop.f32.mrb[11].mxu0 }
 0x218   : > { %v962_v51 = vsel %vm602_vm2, %v960_v46, %v961_v48  ;;  %v963_v1 = vsel %vm602_vm2, %v961_v48, %v960_v46  ;;  %v955_v52 = vsel %vm589_vm1, %v953_v47, %v952_v44  ;;  %v954_v53 = vsel %vm589_vm1, %v952_v44, %v953_v47 }
 0x219   : > { %v956_v58 = vsel %vm1669_vm3, %v955_v52, 0.0  ;;  %v965_v45 = vsel %vm1675_vm4, %v963_v1, 0.0 }
 0x233   : > { %v945_v55 = vpop.f32.mrb[8].mxu1 }
 0x234   : > { %v946_v56 = vadd.f32 %v1158_v54, %v945_v55  ;;  %v1343_v57 = vpop.f32.mrb[9].mxu1 }
 0x235   : > { %v948_v59 = vpop.f32.mrb[10].mxu1 }
 0x236   : > { %v958_v60 = vadd.f32 %v956_v58, %v946_v56  ;;  %v949_v61 = vadd.f32 %v1158_v54, %v948_v59  ;;  %v1344_v62 = vpop.f32.mrb[11].mxu1 }
 0x238   : > { %v966_v63 = vadd.f32 %v962_v51, %v958_v60  ;;  %v959_v0 = vadd.f32 %v954_v53, %v949_v61 }
 0x23a   : > { %v1167_v3 = vmul.f32 -1.442695, %v966_v63  ;;  %v967_v4 = vadd.f32 %v965_v45, %v959_v0 }
 0x23c   : > { %1411 = vpow2.f32 %v1167_v3  ;;  %v1168_v5 = vmul.f32 -1.442695, %v967_v4 }
 0x23e   : > { %1413 = vpow2.f32 %v1168_v5 }
 0x246   : > { %v1412_v6 = vpop.eup %1411 }
 0x247   : > { %v974_v7 = vadd.f32 1.0, %v1412_v6 }
 0x248   : > { %v1414_v8 = vpop.eup %1413 }
 0x249   : > { %1415 = vrcp.f32 %v974_v7  ;;  %v975_v2 = vadd.f32 1.0, %v1414_v8 }
 0x24b   : > { %1417 = vrcp.f32 %v975_v2 }
 0x253   : > { %v1416_v9 = vpop.eup %1415 }
 0x254   : > { %v980_v11 = vmul.f32 %v1416_v9, %v966_v63 }
 0x255   : > { %v1418_v12 = vpop.eup %1417 }
 0x256   : > { %v982_v10 = vadd.f32 %v980_v11, %v1530_v14  ;;  %v981_v13 = vmul.f32 %v1418_v12, %v967_v4 }
 0x258   : > { %984 = vst [vmem:[%s226_s13] sm:$0xff] %v982_v10  ;;  %v983_v16 = vadd.f32 %v981_v13, %v1532_v15 }
 0x25a   : > { %985 = vst [vmem:[%s226_s13 + $0x8] sm:$0xff] %v983_v16 }
 0x25b PF: > { %s15_s18 = sadd.s32 1, %s1425_s18  }
 0x25c   : > { %p12_p4 = scmp.ge.s32.totalorder %s15_s18, 4  }
 0x25e   :  { %14 = sbr.rel (!%p12_p4) target bundleno = 1 (0x1), region = 74 }

</bundles_post_ra>
